<compile_context>
chip_gen: v5e
topology: v5e:2x2
jax: 0.10.0
libtpu: 0.0.40
codegen_flags: <defaults>
</compile_context>

<pallas_src>
import jax
import jax.numpy as jnp
from jax.experimental import pallas as pl
from jax.experimental.pallas import tpu as pltpu

# loss weights from the PyTorch module's __init__
DIRECTION_W = 1.0
TP_W = 0.8
SL_W = 1.2
ENTRY_W = 0.5

LANE = 128


def _round_up(x, m):
    return ((x + m - 1) // m) * m


def _make_kernel(C, K, ce_scale):
    """Loss kernel specialized to (num_classes, packed task rows, ce scale)."""

    def kernel(dir_ref, pt_ref, w_ref, msel_ref, out_ref):
        # Zero the resident per-lane accumulator at the first inner step
        # (re-done for every value of the leading parallel axis).
        @pl.when(pl.program_id(1) == 0)
        def _():
            out_ref[...] = jnp.zeros_like(out_ref)

        # Inputs may be fed as bf16 by the caller; compute stays f32.
        dirb = dir_ref[...].astype(jnp.float32)      # (C+1, TB): C logit rows + 1 label row
        p = pt_ref[0].astype(jnp.float32)            # (K, TB) predictions
        t = pt_ref[1].astype(jnp.float32)            # (K, TB) targets

        # ---- CrossEntropy over the C logit rows (cheap sublane reductions) ----
        rowi = jax.lax.broadcasted_iota(jnp.int32, (C + 1, 1), 0)
        is_logit = rowi < C
        neg_inf = jnp.float32(-jnp.inf)
        m = jnp.max(jnp.where(is_logit, dirb, neg_inf), axis=0, keepdims=True)      # (1, TB)
        e = jnp.exp(jnp.where(is_logit, dirb - m, neg_inf))                         # (C+1, TB)
        lse = m + jnp.log(jnp.sum(e, axis=0, keepdims=True))                        # (1, TB)
        # Label row (row C) broadcast via a masked sublane reduce (no slicing).
        labels = jnp.sum(jnp.where(rowi == C, dirb, 0.0), axis=0, keepdims=True)    # (1, TB)
        # NOTE: out-of-range labels give picked=0 (PyTorch would raise).
        onehot = (rowi.astype(jnp.float32) == labels) & is_logit                    # (C+1, TB)
        picked = jnp.sum(jnp.where(onehot, dirb, 0.0), axis=0, keepdims=True)       # (1, TB)
        ce = lse - picked                                                           # (1, TB)

        # ---- BCE / MSE over the K packed task rows ----
        w = w_ref[...]                       # (K, 1): loss_weight / element_count per row
        is_mse = msel_ref[...] > 0.5         # (K, 1) bool: entry-time (MSE) rows
        # torch.nn.BCELoss semantics: log clamped at -100 BEFORE the multiply.
        p_safe = jnp.where(is_mse, 0.5, p)   # keep logs finite on MSE rows (not selected)
        logp = jnp.maximum(jnp.log(p_safe), -100.0)
        log1mp = jnp.maximum(jnp.log(1.0 - p_safe), -100.0)
        bce = -(t * logp + (1.0 - t) * log1mp)
        diff = p - t
        elem = jnp.where(is_mse, diff * diff, bce) * w                              # (K, TB)

        contrib = jnp.sum(elem, axis=0, keepdims=True) + ce_scale * ce              # (1, TB)
        out_ref[...] += contrib[None, :, :]                                         # (1,1,TB)

    return kernel


def trading_multitask_loss(predictions, targets, *, tile_b=4096, num_cores=2):
    """Fused Pallas version of TradingMultiTaskLoss.forward (full-dict case).

    Returns a scalar f32 total loss.
    """
    logits = predictions["direction_probs"]
    B, C = logits.shape
    T = predictions["long_tp_probs"].shape[-1]
    K = 2 * T + 4                       # [tpL(T), slL, tpS(T), slS, enL, enS]

    # Inputs could be fed as bf16 here to halve HBM bytes (kernel already
    # casts to f32); kept f32 so the result matches the f32 reference exactly.
    # TODO(synk): switch to jnp.bfloat16 for mem-bound production batches.
    compute_dtype = jnp.float32

    def row(x):
        # (B, n) -> (n, B): batch goes onto the lane axis (lane-dense).
        return x.reshape(B, -1).T.astype(compute_dtype)

    preds_t = jnp.concatenate(
        [row(predictions["long_tp_probs"]),
         row(predictions["long_sl_prob"]),
         row(predictions["short_tp_probs"]),
         row(predictions["short_sl_prob"]),
         row(predictions["long_entry_time"]),
         row(predictions["short_entry_time"])], axis=0)
    tgts_t = jnp.concatenate(
        [row(targets["long_tp_targets"]),
         row(targets["long_sl_target"]),
         row(targets["short_tp_targets"]),
         row(targets["short_sl_target"]),
         row(targets["long_entry_time_target"]),
         row(targets["short_entry_time_target"])], axis=0)
    assert preds_t.shape == (K, B) and tgts_t.shape == (K, B)
    pt = jnp.stack([preds_t, tgts_t], axis=0)                       # (2, K, B)

    labels_row = targets["direction"].reshape(1, B).astype(compute_dtype)
    dir_slab = jnp.concatenate([logits.T.astype(compute_dtype), labels_row],
                               axis=0)                              # (C+1, B)

    # ---- tiling: batch lives on the lane axis, TB lanes (batch rows) / step ----
    TB = min(_round_up(B, LANE), _round_up(tile_b, LANE))
    steps_total = pl.cdiv(B, TB)
    P = max(1, min(num_cores, steps_total))       # leading parallel axis (v7x: 2 TCs)
    spc = pl.cdiv(steps_total, P)                 # inner ("arbitrary") steps per slice
    b_pad_total = P * spc * TB
    pad = b_pad_total - B

    if pad:
        # Neutral (exactly-zero-loss) padding columns -> no in-kernel masking:
        #   CE: logits [0, -1e4, ...], label=0 -> lse=0, picked=0.
        #   BCE rows: p=t=1 -> 0.   MSE rows: p=t=0 -> 0.
        dir_pad = jnp.concatenate(
            [jnp.zeros((1, pad), compute_dtype),
             jnp.full((C - 1, pad), -1e4, compute_dtype),
             jnp.zeros((1, pad), compute_dtype)], axis=0)
        dir_slab = jnp.concatenate([dir_slab, dir_pad], axis=1)
        col = jnp.concatenate([jnp.ones((2 * T + 2, pad), compute_dtype),
                               jnp.zeros((2, pad), compute_dtype)], axis=0)
        pt = jnp.concatenate([pt, jnp.stack([col, col], axis=0)], axis=2)

    # Precomputed per-task-row constants (loss_weight / element_count) and the
    # BCE-vs-MSE selector -- passed once, never rebuilt inside the loop.
    w_tp, w_sl, w_en = TP_W / (B * T), SL_W / B, ENTRY_W / B
    wrow = jnp.array([w_tp] * T + [w_sl] + [w_tp] * T + [w_sl] + [w_en, w_en],
                     dtype=jnp.float32).reshape(K, 1)
    mrow = jnp.array([0.0] * (2 * T + 2) + [1.0, 1.0],
                     dtype=jnp.float32).reshape(K, 1)
    ce_scale = DIRECTION_W / B

    kernel = _make_kernel(C, K, ce_scale)
    out = pl.pallas_call(
        kernel,
        out_shape=jax.ShapeDtypeStruct((P, 1, TB), jnp.float32),
        grid=(P, spc),
        in_specs=[
            pl.BlockSpec((C + 1, TB), lambda pi, i: (0, pi * spc + i)),
            pl.BlockSpec((2, K, TB), lambda pi, i: (0, 0, pi * spc + i)),
            pl.BlockSpec((K, 1), lambda pi, i: (0, 0)),    # weight row (constant block)
            pl.BlockSpec((K, 1), lambda pi, i: (0, 0)),    # MSE selector (constant block)
        ],
        # Resident per-lane accumulator block: zeroed at inner step 0,
        # vector-accumulated every step, written back once per parallel slice.
        out_specs=pl.BlockSpec((1, 1, TB), lambda pi, i: (pi, 0, 0)),
        compiler_params=pltpu.CompilerParams(
            dimension_semantics=("parallel", "arbitrary")),
    )(dir_slab, pt, wrow, mrow)

    # Final tiny reduction of P*TB f32 partials (cheap XLA op).
    return jnp.sum(out)


def _reference_loss(predictions, targets):
    """Pure-JAX reference matching the PyTorch semantics (for verification)."""
    logits = predictions["direction_probs"].astype(jnp.float32)
    labels = targets["direction"].astype(jnp.int32)
    logz = jax.scipy.special.logsumexp(logits, axis=-1)
    picked = jnp.take_along_axis(logits, labels[:, None], axis=-1)[:, 0]
    ce = jnp.mean(logz - picked)

    def bce(p, t):
        return jnp.mean(-(t * jnp.maximum(jnp.log(p), -100.0)
                          + (1.0 - t) * jnp.maximum(jnp.log(1.0 - p), -100.0)))

    def mse(p, t):
        return jnp.mean((p - t) ** 2)

    return (DIRECTION_W * ce
            + TP_W * bce(predictions["long_tp_probs"], targets["long_tp_targets"])
            + SL_W * bce(predictions["long_sl_prob"], targets["long_sl_target"])
            + ENTRY_W * mse(predictions["long_entry_time"], targets["long_entry_time_target"])
            + TP_W * bce(predictions["short_tp_probs"], targets["short_tp_targets"])
            + SL_W * bce(predictions["short_sl_prob"], targets["short_sl_target"])
            + ENTRY_W * mse(predictions["short_entry_time"], targets["short_entry_time_target"]))


def _make_inputs(key, B, C, T):
    ks = jax.random.split(key, 16)
    predictions = {
        "direction_probs": jax.random.normal(ks[0], (B, C), jnp.float32),  # CE logits
        "long_tp_probs": jax.nn.sigmoid(jax.random.normal(ks[1], (B, T), jnp.float32)),
        "long_sl_prob": jax.nn.sigmoid(jax.random.normal(ks[2], (B, 1), jnp.float32)),
        "long_entry_time": jax.random.normal(ks[3], (B, 1), jnp.float32),
        "short_tp_probs": jax.nn.sigmoid(jax.random.normal(ks[4], (B, T), jnp.float32)),
        "short_sl_prob": jax.nn.sigmoid(jax.random.normal(ks[5], (B, 1), jnp.float32)),
        "short_entry_time": jax.random.normal(ks[6], (B, 1), jnp.float32),
    }
    targets = {
        "direction": jax.random.randint(ks[7], (B,), 0, C, jnp.int32),
        "long_tp_targets": jax.random.bernoulli(ks[8], 0.5, (B, T)).astype(jnp.float32),
        "long_sl_target": jax.random.bernoulli(ks[9], 0.5, (B, 1)).astype(jnp.float32),
        "long_entry_time_target": jax.random.normal(ks[10], (B, 1), jnp.float32),
        "short_tp_targets": jax.random.bernoulli(ks[11], 0.5, (B, T)).astype(jnp.float32),
        "short_sl_target": jax.random.bernoulli(ks[12], 0.5, (B, 1)).astype(jnp.float32),
        "short_entry_time_target": jax.random.normal(ks[13], (B, 1), jnp.float32),
    }
    return predictions, targets


if __name__ == "__main__":
    key = jax.random.PRNGKey(0)
    k1, k2, k3 = jax.random.split(key, 3)

    # Small case: single tile, single core (B padded up to 128 neutral columns).
    preds, tgts = _make_inputs(k1, 8, 3, 4)
    total = jax.block_until_ready(trading_multitask_loss(preds, tgts))
    ref = jax.block_until_ready(_reference_loss(preds, tgts))
    assert jnp.allclose(total, ref, rtol=1e-4, atol=1e-5), (total, ref)

    # Exercise the 2-core parallel axis + ragged padding (B=200, TB=128 -> grid (2,1)).
    preds2, tgts2 = _make_inputs(k2, 200, 3, 4)
    total2 = jax.block_until_ready(trading_multitask_loss(preds2, tgts2, tile_b=128))
    ref2 = jax.block_until_ready(_reference_loss(preds2, tgts2))
    assert jnp.allclose(total2, ref2, rtol=1e-4, atol=1e-5), (total2, ref2)

    # Exercise multi-step accumulation per core (B=600, TB=128 -> grid (2,3)).
    preds3, tgts3 = _make_inputs(k3, 600, 3, 4)
    total3 = jax.block_until_ready(trading_multitask_loss(preds3, tgts3, tile_b=128))
    ref3 = jax.block_until_ready(_reference_loss(preds3, tgts3))
    assert jnp.allclose(total3, ref3, rtol=1e-4, atol=1e-5), (total3, ref3)

    # Default (large-tile) path on the same data.
    total3b = jax.block_until_ready(trading_multitask_loss(preds3, tgts3))
    assert jnp.allclose(total3b, ref3, rtol=1e-4, atol=1e-5), (total3b, ref3)

    # TODO(synk): the PyTorch module's dict-key-presence branches and the
    # tensor/tensor fallback MSE path are handled outside the kernel; this
    # kernel implements the full 7-term dict case only.
    print("KERNEL_OK")
</pallas_src>

<mosaic_0001>
module attributes {stable_mosaic.version = 11 : i64} {
  func.func @kernel(%arg0: i32, %arg1: i32, %arg2: memref<4x128xf32, #tpu.memory_space<vmem>>, %arg3: memref<2x12x128xf32, #tpu.memory_space<vmem>>, %arg4: memref<12x1xf32, #tpu.memory_space<vmem>>, %arg5: memref<12x1xf32, #tpu.memory_space<vmem>>, %arg6: memref<1x1x128xf32, #tpu.memory_space<vmem>>) attributes {dimension_semantics = [#tpu.dimension_semantics<parallel>, #tpu.dimension_semantics<arbitrary>], iteration_bounds = array<i64: 1, 1>, scalar_prefetch = 0 : i64, scratch_operands = 0 : i64, tpu.core_type = #tpu.core_type<tc>, window_params = [{transform_indices = @transform_0, window_bounds = array<i64: 4, 128>}, {transform_indices = @transform_1, window_bounds = array<i64: 2, 12, 128>}, {pipeline_mode = #tpu.pipeline_mode<synchronous>, transform_indices = @transform_2, window_bounds = array<i64: 12, 1>}, {pipeline_mode = #tpu.pipeline_mode<synchronous>, transform_indices = @transform_3, window_bounds = array<i64: 12, 1>}, {transform_indices = @transform_4, window_bounds = array<i64: 1, 1, 128>}]} {
    %c0_i32 = arith.constant 0 : i32
    %0 = arith.cmpi eq, %arg1, %c0_i32 : i32
    %1 = arith.extui %0 : i1 to i32
    %c0_i32_0 = arith.constant 0 : i32
    %2 = arith.cmpi ne, %1, %c0_i32_0 : i32
    scf.if %2 {
      %cst_34 = arith.constant 0.000000e+00 : f32
      %86 = vector.broadcast %cst_34 : f32 to vector<1x1x128xf32>
      %c0_35 = arith.constant 0 : index
      %c0_36 = arith.constant 0 : index
      %c0_37 = arith.constant 0 : index
      %87 = vector.load %arg6[%c0_35, %c0_36, %c0_37] : memref<1x1x128xf32, #tpu.memory_space<vmem>>, vector<1x1x128xf32>
      tpu.vector_store %arg6[%c0_35, %c0_36, %c0_37], %86 {strides = array<i32>} : memref<1x1x128xf32, #tpu.memory_space<vmem>>, vector<1x1x128xf32>,
    } else {
    }
    %c0 = arith.constant 0 : index
    %c0_1 = arith.constant 0 : index
    %3 = vector.load %arg2[%c0, %c0_1] : memref<4x128xf32, #tpu.memory_space<vmem>>, vector<4x128xf32>
    %c0_2 = arith.constant 0 : index
    %c0_3 = arith.constant 0 : index
    %c0_4 = arith.constant 0 : index
    %4 = vector.load %arg3[%c0_2, %c0_3, %c0_4] : memref<2x12x128xf32, #tpu.memory_space<vmem>>, vector<1x12x128xf32>
    %5 = vector.shape_cast %4 : vector<1x12x128xf32> to vector<12x128xf32>
    %c1 = arith.constant 1 : index
    %c0_5 = arith.constant 0 : index
    %c0_6 = arith.constant 0 : index
    %6 = vector.load %arg3[%c1, %c0_5, %c0_6] : memref<2x12x128xf32, #tpu.memory_space<vmem>>, vector<1x12x128xf32>
    %7 = vector.shape_cast %6 : vector<1x12x128xf32> to vector<12x128xf32>
    %8 = tpu.iota {dimensions = array<i32: 0>} : vector<4x1xi32>
    %c3_i32 = arith.constant 3 : i32
    %9 = vector.broadcast %c3_i32 : i32 to vector<4x1xi32>
    %10 = arith.cmpi slt, %8, %9 : vector<4x1xi32>
    %cst = arith.constant 0xFF800000 : f32
    %11 = vector.shape_cast %10 : vector<4x1xi1> to vector<4x1xi1>
    %12 = vector.broadcast %11 : vector<4x1xi1> to vector<4x128xi1>
    %13 = vector.broadcast %cst : f32 to vector<4x128xf32>
    %14 = arith.select %12, %3, %13 : vector<4x128xi1>, vector<4x128xf32>
    %cst_7 = arith.constant dense<0xFF800000> : vector<128xf32>
    %15 = vector.multi_reduction <maximumf>, %14, %cst_7 [0] : vector<4x128xf32> to vector<128xf32>
    %16 = vector.shape_cast %15 : vector<128xf32> to vector<1x128xf32>
    %17 = vector.broadcast %16 : vector<1x128xf32> to vector<4x128xf32>
    %18 = arith.subf %3, %17 : vector<4x128xf32>
    %cst_8 = arith.constant 0xFF800000 : f32
    %19 = vector.shape_cast %10 : vector<4x1xi1> to vector<4x1xi1>
    %20 = vector.broadcast %19 : vector<4x1xi1> to vector<4x128xi1>
    %21 = vector.broadcast %cst_8 : f32 to vector<4x128xf32>
    %22 = arith.select %20, %18, %21 : vector<4x128xi1>, vector<4x128xf32>
    %23 = math.exp %22 : vector<4x128xf32>
    %cst_9 = arith.constant dense<0.000000e+00> : vector<128xf32>
    %24 = vector.multi_reduction <add>, %23, %cst_9 [0] : vector<4x128xf32> to vector<128xf32>
    %25 = vector.shape_cast %24 : vector<128xf32> to vector<1x128xf32>
    %26 = math.log %25 : vector<1x128xf32>
    %27 = arith.addf %16, %26 : vector<1x128xf32>
    %c3_i32_10 = arith.constant 3 : i32
    %28 = vector.broadcast %c3_i32_10 : i32 to vector<4x1xi32>
    %29 = arith.cmpi eq, %8, %28 : vector<4x1xi32>
    %cst_11 = arith.constant 0.000000e+00 : f32
    %30 = vector.shape_cast %29 : vector<4x1xi1> to vector<4x1xi1>
    %31 = vector.broadcast %30 : vector<4x1xi1> to vector<4x128xi1>
    %32 = vector.broadcast %cst_11 : f32 to vector<4x128xf32>
    %33 = arith.select %31, %3, %32 : vector<4x128xi1>, vector<4x128xf32>
    %cst_12 = arith.constant dense<0.000000e+00> : vector<128xf32>
    %34 = vector.multi_reduction <add>, %33, %cst_12 [0] : vector<4x128xf32> to vector<128xf32>
    %35 = vector.shape_cast %34 : vector<128xf32> to vector<1x128xf32>
    %36 = arith.sitofp %8 : vector<4x1xi32> to vector<4x1xf32>
    %37 = vector.broadcast %36 : vector<4x1xf32> to vector<4x128xf32>
    %38 = vector.broadcast %35 : vector<1x128xf32> to vector<4x128xf32>
    %39 = arith.cmpf oeq, %37, %38 : vector<4x128xf32>
    %40 = vector.broadcast %10 : vector<4x1xi1> to vector<4x128xi1>
    %41 = arith.andi %39, %40 : vector<4x128xi1>
    %cst_13 = arith.constant 0.000000e+00 : f32
    %42 = vector.broadcast %cst_13 : f32 to vector<4x128xf32>
    %43 = arith.select %41, %3, %42 : vector<4x128xi1>, vector<4x128xf32>
    %cst_14 = arith.constant dense<0.000000e+00> : vector<128xf32>
    %44 = vector.multi_reduction <add>, %43, %cst_14 [0] : vector<4x128xf32> to vector<128xf32>
    %45 = vector.shape_cast %44 : vector<128xf32> to vector<1x128xf32>
    %46 = arith.subf %27, %45 : vector<1x128xf32>
    %c0_15 = arith.constant 0 : index
    %c0_16 = arith.constant 0 : index
    %47 = vector.load %arg4[%c0_15, %c0_16] : memref<12x1xf32, #tpu.memory_space<vmem>>, vector<12x1xf32>
    %c0_17 = arith.constant 0 : index
    %c0_18 = arith.constant 0 : index
    %48 = vector.load %arg5[%c0_17, %c0_18] : memref<12x1xf32, #tpu.memory_space<vmem>>, vector<12x1xf32>
    %cst_19 = arith.constant 5.000000e-01 : f32
    %49 = vector.broadcast %cst_19 : f32 to vector<12x1xf32>
    %50 = arith.cmpf ogt, %48, %49 : vector<12x1xf32>
    %cst_20 = arith.constant 5.000000e-01 : f32
    %51 = vector.shape_cast %50 : vector<12x1xi1> to vector<12x1xi1>
    %52 = vector.broadcast %51 : vector<12x1xi1> to vector<12x128xi1>
    %53 = vector.broadcast %cst_20 : f32 to vector<12x128xf32>
    %54 = arith.select %52, %53, %5 : vector<12x128xi1>, vector<12x128xf32>
    %55 = math.log %54 : vector<12x128xf32>
    %cst_21 = arith.constant -1.000000e+02 : f32
    %56 = vector.broadcast %cst_21 : f32 to vector<12x128xf32>
    %57 = arith.maximumf %55, %56 : vector<12x128xf32>
    %cst_22 = arith.constant 1.000000e+00 : f32
    %58 = vector.broadcast %cst_22 : f32 to vector<12x128xf32>
    %59 = arith.subf %58, %54 : vector<12x128xf32>
    %60 = math.log %59 : vector<12x128xf32>
    %cst_23 = arith.constant -1.000000e+02 : f32
    %61 = vector.broadcast %cst_23 : f32 to vector<12x128xf32>
    %62 = arith.maximumf %60, %61 : vector<12x128xf32>
    %63 = arith.mulf %7, %57 : vector<12x128xf32>
    %cst_24 = arith.constant 1.000000e+00 : f32
    %64 = vector.broadcast %cst_24 : f32 to vector<12x128xf32>
    %65 = arith.subf %64, %7 : vector<12x128xf32>
    %66 = arith.mulf %65, %62 : vector<12x128xf32>
    %67 = arith.addf %63, %66 : vector<12x128xf32>
    %cst_25 = arith.constant 0.000000e+00 : f32
    %68 = vector.broadcast %cst_25 : f32 to vector<12x128xf32>
    %69 = arith.subf %68, %67 : vector<12x128xf32>
    %70 = arith.subf %5, %7 : vector<12x128xf32>
    %71 = arith.mulf %70, %70 : vector<12x128xf32>
    %72 = vector.shape_cast %50 : vector<12x1xi1> to vector<12x1xi1>
    %73 = vector.broadcast %72 : vector<12x1xi1> to vector<12x128xi1>
    %74 = arith.select %73, %71, %69 : vector<12x128xi1>, vector<12x128xf32>
    %75 = vector.broadcast %47 : vector<12x1xf32> to vector<12x128xf32>
    %76 = arith.mulf %74, %75 : vector<12x128xf32>
    %cst_26 = arith.constant dense<0.000000e+00> : vector<128xf32>
    %77 = vector.multi_reduction <add>, %76, %cst_26 [0] : vector<12x128xf32> to vector<128xf32>
    %78 = vector.shape_cast %77 : vector<128xf32> to vector<1x128xf32>
    %cst_27 = arith.constant 1.250000e-01 : f32
    %79 = vector.broadcast %cst_27 : f32 to vector<1x128xf32>
    %80 = arith.mulf %79, %46 : vector<1x128xf32>
    %81 = arith.addf %78, %80 : vector<1x128xf32>
    %c0_28 = arith.constant 0 : index
    %c0_29 = arith.constant 0 : index
    %c0_30 = arith.constant 0 : index
    %82 = vector.load %arg6[%c0_28, %c0_29, %c0_30] : memref<1x1x128xf32, #tpu.memory_space<vmem>>, vector<1x1x128xf32>
    %83 = vector.shape_cast %81 : vector<1x128xf32> to vector<1x1x128xf32>
    %84 = arith.addf %82, %83 : vector<1x1x128xf32>
    %c0_31 = arith.constant 0 : index
    %c0_32 = arith.constant 0 : index
    %c0_33 = arith.constant 0 : index
    %85 = vector.load %arg6[%c0_31, %c0_32, %c0_33] : memref<1x1x128xf32, #tpu.memory_space<vmem>>, vector<1x1x128xf32>
    tpu.vector_store %arg6[%c0_31, %c0_32, %c0_33], %84 {strides = array<i32>} : memref<1x1x128xf32, #tpu.memory_space<vmem>>, vector<1x1x128xf32>,
    return
  }
  func.func @transform_0(%arg0: i32, %arg1: i32) -> (i32, i32) {
    %c1_i32 = arith.constant 1 : i32
    %0 = arith.muli %arg0, %c1_i32 : i32
    %1 = arith.addi %0, %arg1 : i32
    %c0_i32 = arith.constant 0 : i32
    %c0_i32_0 = arith.constant 0 : i32
    return %c0_i32, %1 : i32, i32
  }
  func.func @transform_1(%arg0: i32, %arg1: i32) -> (i32, i32, i32) {
    %c1_i32 = arith.constant 1 : i32
    %0 = arith.muli %arg0, %c1_i32 : i32
    %1 = arith.addi %0, %arg1 : i32
    %c0_i32 = arith.constant 0 : i32
    %c0_i32_0 = arith.constant 0 : i32
    %c0_i32_1 = arith.constant 0 : i32
    return %c0_i32, %c0_i32_0, %1 : i32, i32, i32
  }
  func.func @transform_2(%arg0: i32, %arg1: i32) -> (i32, i32) {
    %c0_i32 = arith.constant 0 : i32
    %c0_i32_0 = arith.constant 0 : i32
    %c0_i32_1 = arith.constant 0 : i32
    return %c0_i32, %c0_i32_0 : i32, i32
  }
  func.func @transform_3(%arg0: i32, %arg1: i32) -> (i32, i32) {
    %c0_i32 = arith.constant 0 : i32
    %c0_i32_0 = arith.constant 0 : i32
    %c0_i32_1 = arith.constant 0 : i32
    return %c0_i32, %c0_i32_0 : i32, i32
  }
  func.func @transform_4(%arg0: i32, %arg1: i32) -> (i32, i32, i32) {
    %c0_i32 = arith.constant 0 : i32
    %c0_i32_0 = arith.constant 0 : i32
    %c0_i32_1 = arith.constant 0 : i32
    return %arg0, %c0_i32, %c0_i32_0 : i32, i32, i32
  }
}

</mosaic_0001>

<bundles_post_ra>
// kernel: tpu_custom_call.1
= control target key start
LH: loop header
LB: loop body
LE: loop exit
PB: predicated region body
PF: predicated region fallthrough
CT: control target
= control target key end

     0   :  { %v260_v2 = vmov 0   ;;  %s340_s0 = inlined_call_operand.vmem [shape: f32[4,128], index: 0, kind: input, shape index: {}]   ;;  %s341_s1 = inlined_call_operand.vmem [shape: f32[2,12,128], index: 1, kind: input, shape index: {}]   ;;  %s342_s2 = inlined_call_operand.vmem [shape: f32[12,1], index: 2, kind: input, shape index: {}]   ;;  %s343_s3 = inlined_call_operand.vmem [shape: f32[12,1], index: 3, kind: input, shape index: {}]   ;;  %s344_s4 = inlined_call_operand.hbm [shape: f32[1,1,128], index: 4, kind: output, shape index: {}]  }
   0x1   :  { %v117_v0 = vld [vmem:[%s343_s3 + $0x8] sm:$0xf]  ;;  %220 = vset.pattern.permute.xlu0 %v260_v2  ;;  %221 = vset.pattern.permute.xlu1 %v260_v2 }
   0x2   :  { %v115_v1 = vld [vmem:[%s342_s2 + $0x8] sm:$0xf]  ;;  %vm119_vm0 = vcmp.gt.f32.partialorder %v117_v0, 0.5 }
   0x3   :  { %9 = vsyncpa [#allocation3], 0  ;;  %v121_v3 = vsel %vm119_vm0, 1, %v260_v2  ;;  %v116_v4 = vld [vmem:[%s343_s3] sm:$0xff]  ;;  %169 = vperm.xlu1 %221, %v115_v1   ;;  %v63_v7 = vlaneseq  ;;  %vm69_vm3 = vcmask 1043456   ;;  %v261_v45 = vmov 0.0  }
   0x4   :  { %126 = vperm.xlu0 %220, %v121_v3   ;;  %vm118_vm1 = vcmp.gt.f32.partialorder %v116_v4, 0.5  ;;  %v114_v5 = vld [vmem:[%s342_s2] sm:$0xff]  ;;  %v59_v31 = vld [vmem:[%s341_s1 + $0x8] sm:$0xf]  ;;  %v216_v43 = vld [vmem:[%s341_s1 + $0x18] sm:$0xf] }
   0x5   :  { %v120_v6 = vsel %vm118_vm1, 1, %v260_v2  ;;  %v64_v8 = vshrl.u32 %v63_v7, 7  ;;  %v57_v9 = vld [vmem:[%s340_s0] sm:$0xf]  ;;  %56 = vst [vmem:[#allocation2] sm:$0x1] %v261_v45  ;;  %v157_v61 = vsub.f32 %v59_v31, %v216_v43 }
   0x6   :  { %v58_v40 = vld [vmem:[%s341_s1] sm:$0xff]  ;;  %v149_v53 = vsub.f32 1.0, %v216_v43  ;;  %v215_v62 = vld [vmem:[%s341_s1 + $0x10] sm:$0xff]  ;;  %s262_s1 = smov [#allocation2]   ;;  %s194_s7 = sshll.u32 %s344_s4, 4  ;;  %s195_s7 = int_to_ptr.hbm [resolvable:$true] %s194_s7 }
   0x7   :  { %vm65_vm2 = vcmp.lt.s32.totalorder %v64_v8, 3  ;;  %vm91_vm4 = vcmp.eq.s32.totalorder %v64_v8, 3  ;;  %v102_v33 = vcvt.s32.f32 %v64_v8  ;;  %v159_v8 = vmul.f32 %v157_v61, %v157_v61  ;;  %s192_s30 = sshll.u32 %s262_s1, 4  ;;  %s193_s30 = int_to_ptr.vmem [resolvable:$true] %s192_s30 }
   0x8   :  { %v68_v10 = vsel %vm65_vm2, %v57_v9, -inf  ;;  %v94_v20 = vsel %vm91_vm4, %v57_v9, 0.0 }
   0x9   :  { %v70_v11 = vsel %vm69_vm3, %v68_v10, -inf  ;;  %v95_v22 = vsel %vm69_vm3, %v94_v20, 0.0 }
   0xa   :  { %v71_v12 = vrot.slane %v70_v11, 4  ;;  %v96_v23 = vrot.slane %v95_v22, 4 }
   0xb   :  { %164 = vperm.xlu1 %221, %v114_v5  }
   0xc   :  { %123 = vperm.xlu0 %220, %v120_v6   ;;  %v72_v13 = vmax.f32 %v70_v11, %v71_v12  ;;  %v97_v24 = vadd.f32 %v96_v23, %v95_v22  ;;  %v148_v6 = vsub.f32 1.0, %v215_v62  ;;  %v156_v11 = vsub.f32 %v58_v40, %v215_v62 }
   0xe   :  { %v73_v14 = vrot.slane %v72_v13, 2  ;;  %v98_v25 = vrot.slane %v97_v24, 2 }
  0x10   :  { %v74_v15 = vmax.f32 %v72_v13, %v73_v14  ;;  %v99_v26 = vadd.f32 %v98_v25, %v97_v24 }
  0x12   :  { %v75_v16 = vrot.slane %v74_v15, 1  ;;  %v100_v29 = vrot.slane %v99_v26, 1 }
  0x14   :  { %v305_v17 = vmax.f32 %v74_v15, %v75_v16  ;;  %v101_v32 = vadd.f32 %v100_v29, %v99_v26  ;;  %v158_v16 = vmul.f32 %v156_v11, %v156_v11 }
  0x16   :  { %v77_v18 = vsub.f32 %v57_v9, %v305_v17  ;;  %vm103_vm6 = vcmp.eq.f32.partialorder %v102_v33, %v101_v32 }
  0x17   :  { %vm316_vm7 = vmand %vm103_vm6, %vm65_vm2 }
  0x18   :  { %v78_v19 = vsel %vm65_vm2, %v77_v18, -inf  ;;  %v105_v44 = vsel %vm316_vm7, %v57_v9, 0.0 }
  0x19   :  { %v79_v21 = vmul.f32 1.442695, %v78_v19  ;;  %v106_v54 = vsel %vm69_vm3, %v105_v44, 0.0 }
  0x1a   :  { %v107_v57 = vrot.slane %v106_v54, 4 }
  0x1b   :  { %222 = vpow2.f32 %v79_v21 }
  0x1c   :  { %v108_v3 = vadd.f32 %v107_v57, %v106_v54 }
  0x1e   :  { %v109_v12 = vrot.slane %v108_v3, 2 }
  0x20   :  { %v110_v19 = vadd.f32 %v109_v12, %v108_v3 }
  0x21   :  { %v223_v27 = vpop.eup %222 }
  0x22   :  { %v81_v28 = vsel %vm69_vm3, %v223_v27, 0.0  ;;  %v111_v27 = vrot.slane %v110_v19, 1 }
  0x23   :  { %v82_v30 = vrot.slane %v81_v28, 4 }
  0x24   :  { %v112_v32 = vadd.f32 %v111_v27, %v110_v19 }
  0x25   :  { %v83_v36 = vadd.f32 %v82_v30, %v81_v28 }
  0x27   :  { %v84_v38 = vrot.slane %v83_v36, 2 }
  0x29   :  { %v85_v48 = vadd.f32 %v84_v38, %v83_v36 }
  0x2b   :  { %v86_v56 = vrot.slane %v85_v48, 1 }
  0x2d   :  { %v87_v1 = vadd.f32 %v86_v56, %v85_v48 }
  0x75   :  { %v170_v7 = vpop.permute.xlu1 %169 }
  0x76   :  { %v127_v34 = vpop.permute.xlu0 %126 }
  0x77   :  { %vm129_vm5 = vcmp.eq.s32.totalorder %v127_v34, 1 }
  0x78   :  { %v131_v35 = vsel %vm129_vm5, 0.5, %v59_v31 }
  0x79   :  { %224 = vlog2.f32 %v131_v35  ;;  %v139_v37 = vsub.f32 1.0, %v131_v35 }
  0x7b   :  { %226 = vlog2.f32 %v139_v37 }
  0x7d   :  { %v165_v23 = vpop.permute.xlu1 %164 }
  0x7e   :  { %v124_v41 = vpop.permute.xlu0 %123 }
  0x7f   :  { %v225_v42 = vpop.eup %224  ;;  %vm128_vm8 = vcmp.eq.s32.totalorder %v124_v41, 1 }
  0x80   :  { %v135_v46 = vmul.f32 0.6931472, %v225_v42  ;;  %v130_v47 = vsel %vm128_vm8, 0.5, %v58_v40  ;;  %v184_v40 = vld [vmem:[#allocation2] sm:$0x1] }
  0x81   :  { %v227_v49 = vpop.eup %226  ;;  %228 = vlog2.f32 %v130_v47  ;;  %v138_v50 = vsub.f32 1.0, %v130_v47 }
  0x82   :  { %v137_v51 = vmax.f32 %v135_v46, -100.0  ;;  %v143_v52 = vmul.f32 0.6931472, %v227_v49 }
  0x83   :  { %230 = vlog2.f32 %v138_v50 }
  0x84   :  { %v145_v55 = vmax.f32 %v143_v52, -100.0  ;;  %v147_v58 = vmul.f32 %v216_v43, %v137_v51  ;;  %232 = vlog2.f32 %v87_v1 }
  0x86   :  { %v151_v59 = vmul.f32 %v149_v53, %v145_v55 }
  0x87   :  { %v229_v60 = vpop.eup %228 }
  0x88   :  { %v133_v63 = vmul.f32 0.6931472, %v229_v60  ;;  %v153_v0 = vadd.f32 %v151_v59, %v147_v58 }
  0x89   :  { %v231_v2 = vpop.eup %230 }
  0x8a   :  { %v136_v4 = vmax.f32 %v133_v63, -100.0  ;;  %v141_v5 = vmul.f32 0.6931472, %v231_v2  ;;  %v155_v9 = vsub.f32 0.0, %v153_v0  ;;  %v233_v20 = vpop.eup %232 }
  0x8b   :  { %v89_v26 = vmul.f32 0.6931472, %v233_v20 }
  0x8c   :  { %v144_v10 = vmax.f32 %v141_v5, -100.0  ;;  %v146_v13 = vmul.f32 %v215_v62, %v136_v4  ;;  %v161_v15 = vsel %vm129_vm5, %v159_v8, %v155_v9 }
  0x8d   :  { %v173_v21 = vmul.f32 %v170_v7, %v161_v15  ;;  %v90_v31 = vadd.f32 %v89_v26, %v305_v17 }
  0x8e   :  { %v150_v14 = vmul.f32 %v148_v6, %v144_v10 }
  0x8f   :  { %v174_v28 = vsel %vm69_vm3, %v173_v21, 0.0  ;;  %v113_v35 = vsub.f32 %v90_v31, %v112_v32 }
  0x90   :  { %v152_v18 = vadd.f32 %v150_v14, %v146_v13 }
  0x91   :  { %v182_v38 = vmul.f32 0.125, %v113_v35 }
  0x92   :  { %v154_v22 = vsub.f32 0.0, %v152_v18 }
  0x94   :  { %v160_v24 = vsel %vm128_vm8, %v158_v16, %v154_v22 }
  0x95   :  { %v172_v25 = vmul.f32 %v165_v23, %v160_v24 }
  0x97   :  { %v175_v29 = vadd.f32 %v174_v28, %v172_v25 }
  0x99   :  { %v176_v30 = vrot.slane %v175_v29, 4 }
  0x9b   :  { %v177_v33 = vadd.f32 %v176_v30, %v175_v29 }
  0x9d   :  { %v178_v34 = vrot.slane %v177_v33, 2 }
  0x9f   :  { %v179_v36 = vadd.f32 %v178_v34, %v177_v33 }
  0xa1   :  { %v180_v37 = vrot.slane %v179_v36, 1 }
  0xa3   :  { %v181_v39 = vadd.f32 %v180_v37, %v179_v36 }
  0xa5   :  { %v183_v41 = vadd.f32 %v182_v38, %v181_v39 }
  0xa7   :  { %v185_v42 = vadd.f32 %v184_v40, %v183_v41 }
  0xa9   :  { %186 = vst [vmem:[#allocation2] sm:$0x1] %v185_v42 }
  0xaa   :  { %197 = dma.vmem_to_hbm [thread:$0]  %s193_s30, 16, %s195_s7, [#allocation3]  }
  0xab   :  { %258 = dma.done.wait [#allocation3], 16  }
  0xac   :  { %259 = vsyncadd [#allocation3], 4294967280 }
  0xad   :  { %202 = vsyncpa [#allocation3], 1 }

</bundles_post_ra>
